<compile_context>
chip_gen: v6e
topology: v6e:2x2x1
jax: 0.10.0
libtpu: 0.0.40
codegen_flags: <defaults>
</compile_context>

<pallas_src>
import functools

import jax
import jax.numpy as jnp
from jax.experimental import pallas as pl
from jax.experimental.pallas import tpu as pltpu


def _round_up(x, m):
  return ((x + m - 1) // m) * m


# ----------------------------------------------------------------------------
# Fused Pallas kernel: GeneEncoder + read-out linear + CellEncoder + Z store
# ----------------------------------------------------------------------------
def fused_multiview_kernel(
    # gene-encoder operands
    a_g_ref, x_g_ref, gw1_ref,
    # cell-encoder operands
    a_c_ref, x_c_ref, cw1_ref,
    # packed square weights [gw2, cw2, w3_0 .. w3_{S-1}] and packed biases
    sqw_ref, bias_ref,
    # outputs
    z_ref, gene_emb_ref,
    *, num_subvertices, hidden_pad, gene_prop_first, cell_prop_first):
  f32 = jnp.float32
  bf16 = jnp.bfloat16
  S = num_subvertices
  Hp = hidden_pad

  def gcn2(a, x, w1, b1, w2, b2, prop_first):
    # layer 1: pick the association order with the cheaper inner width
    # (min(F, H)); both orders are mathematically identical for a linear layer.
    if prop_first:
      ax = jnp.dot(a, x, preferred_element_type=f32)
      h = jnp.dot(ax.astype(bf16), w1, preferred_element_type=f32) + b1
    else:
      xw = jnp.dot(x, w1, preferred_element_type=f32)
      h = jnp.dot(a, xw.astype(bf16), preferred_element_type=f32) + b1
    h = jnp.maximum(h, 0.0)                                   # f32 bias + ReLU
    # layer 2: project then propagate.
    hw = jnp.dot(h.astype(bf16), w2, preferred_element_type=f32)
    return jnp.dot(a, hw.astype(bf16), preferred_element_type=f32) + b2

  # ---- GeneEncoder.embed ---------------------------------------------------
  emb = gcn2(a_g_ref[...], x_g_ref[...], gw1_ref[...],
             bias_ref[0:1, :], sqw_ref[0], bias_ref[1:2, :],
             gene_prop_first)
  gene_emb_ref[...] = emb                                     # unmasked store

  # ---- read-out linear -------------------------------------------------------
  # The PyTorch .view(V, S*H) assumes gene node index = vertex*S + subvertex.
  # flat[v, s*H:(s+1)*H] = emb[v*S + s, :], so
  #   Z_g = sum_s emb[s::S, :] @ W3[s] + b
  # implemented with strided sublane reads of the just-stored embedding
  # (load-slot / XLU work only, no selection matmuls, no reshape/relayout).
  num_vertices = gene_emb_ref.shape[0] // S
  zg = bias_ref[4:5, :]                                       # lin_b, (1, Hp) f32
  for s in range(S):                                          # S small & static
    rows = gene_emb_ref[pl.ds(s, num_vertices, stride=S), :]  # (V, Hp)
    zg = zg + jnp.dot(rows.astype(bf16), sqw_ref[2 + s],
                      preferred_element_type=f32)

  # ---- CellEncoder -----------------------------------------------------------
  zc = gcn2(a_c_ref[...], x_c_ref[...], cw1_ref[...],
            bias_ref[2:3, :], sqw_ref[1], bias_ref[3:4, :],
            cell_prop_first)

  # Z = [Z_c | Z_g]: two static, 128-lane-aligned slice stores (no concat copy).
  z_ref[:, :Hp] = zc
  z_ref[:, Hp:2 * Hp] = zg


# ----------------------------------------------------------------------------
# Wrapper: one pallas_call, full-array VMEM blocks (everything fits at toy size)
# ----------------------------------------------------------------------------
def multiview_encoder_pallas(params, a_hat_c, a_hat_g, x_c, x_g,
                             num_subvertices):
  bf16 = jnp.bfloat16
  f32 = jnp.float32
  n_c, num_feat_c = x_c.shape
  n_g, num_feat_g = x_g.shape
  hidden = params["c_w1"].shape[0]
  S = num_subvertices
  assert n_g % S == 0
  V = n_g // S
  # torch.cat((Z_c, Z_g), dim=1) requires matching row counts.
  assert V == n_c

  LANE = 128
  Hp = _round_up(hidden, LANE)
  Fcp = _round_up(num_feat_c, LANE)
  Fgp = _round_up(num_feat_g, LANE)

  def pad2(x, r, c):
    return jnp.pad(x, ((0, r - x.shape[0]), (0, c - x.shape[1])))

  # Weights pre-transposed to (in, out), zero-padded to 128-lane widths, bf16.
  gw1 = pad2(params["g_w1"].T, Fgp, Hp).astype(bf16)          # (Fgp, Hp)
  cw1 = pad2(params["c_w1"].T, Fcp, Hp).astype(bf16)          # (Fcp, Hp)
  gw2 = pad2(params["g_w2"].T, Hp, Hp)
  cw2 = pad2(params["c_w2"].T, Hp, Hp)
  # Read-out weight split into per-subvertex (H, H) blocks, each zero-padded.
  w3 = params["lin_w"].T.reshape(S, hidden, hidden)
  w3p = jnp.stack([pad2(w3[s], Hp, Hp) for s in range(S)], axis=0)
  # Pack every (H, H)-shaped weight into ONE operand (one DMA):
  sqw = jnp.concatenate([gw2[None], cw2[None], w3p], axis=0).astype(bf16)

  # Pack the five bias vectors into ONE (5, Hp) f32 operand (one DMA).
  def padb(b):
    return jnp.pad(b, (0, Hp - hidden))
  bias = jnp.stack([padb(params["g_b1"]), padb(params["g_b2"]),
                    padb(params["c_b1"]), padb(params["c_b2"]),
                    padb(params["lin_b"])], axis=0).astype(f32)

  a_g = a_hat_g.astype(bf16)
  a_c = a_hat_c.astype(bf16)
  xg = pad2(x_g, n_g, Fgp).astype(bf16)
  xc = pad2(x_c, n_c, Fcp).astype(bf16)

  kernel = functools.partial(
      fused_multiview_kernel,
      num_subvertices=S, hidden_pad=Hp,
      gene_prop_first=num_feat_g < hidden,
      cell_prop_first=num_feat_c < hidden)

  operands = (a_g, xg, gw1, a_c, xc, cw1, sqw, bias)

  def full_spec(shape):
    nd = len(shape)
    return pl.BlockSpec(shape, lambda i, _nd=nd: (0,) * _nd)

  z_pad, emb_pad = pl.pallas_call(
      kernel,
      out_shape=(
          jax.ShapeDtypeStruct((n_c, 2 * Hp), f32),
          jax.ShapeDtypeStruct((n_g, Hp), f32),
      ),
      grid=(1,),
      in_specs=[full_spec(op.shape) for op in operands],
      out_specs=(full_spec((n_c, 2 * Hp)), full_spec((n_g, Hp))),
      compiler_params=pltpu.CompilerParams(
          dimension_semantics=("arbitrary",),
          # explicit scoped-VMEM budget; safe on 64 MiB (v7x) and 128 MiB parts
          vmem_limit_bytes=32 * 1024 * 1024),
  )(*operands)

  # Slice the zero-padded lanes back off outside the kernel (tiny XLA slices).
  z_c = z_pad[:, :hidden]
  z_g = z_pad[:, Hp:Hp + hidden]
  z = jnp.concatenate([z_c, z_g], axis=1)
  gene_embeddings = emb_pad[:, :hidden]
  return z, z_c, z_g, gene_embeddings


# ----------------------------------------------------------------------------
# Glue: GCN normalization (dense A_hat), parameter setup, full forward
# ----------------------------------------------------------------------------
def gcn_norm_adj(edge_index, num_nodes):
  """Dense D^{-1/2} (A + I) D^{-1/2}, matching PyG GCNConv defaults."""
  src = edge_index[0]
  dst = edge_index[1]
  self_idx = jnp.arange(num_nodes, dtype=edge_index.dtype)
  src = jnp.concatenate([src, self_idx])
  dst = jnp.concatenate([dst, self_idx])
  a = jnp.zeros((num_nodes, num_nodes), jnp.float32).at[dst, src].add(1.0)
  deg = a.sum(axis=1)
  dinv = jnp.where(deg > 0, jax.lax.rsqrt(deg), 0.0)
  return a * dinv[:, None] * dinv[None, :]


def init_params(key, num_feat_c, num_feat_g, hidden, num_subvertices):
  ks = jax.random.split(key, 10)
  scale = 0.1
  return {
      "c_w1": scale * jax.random.normal(ks[0], (hidden, num_feat_c), jnp.float32),
      "c_b1": scale * jax.random.normal(ks[1], (hidden,), jnp.float32),
      "c_w2": scale * jax.random.normal(ks[2], (hidden, hidden), jnp.float32),
      "c_b2": scale * jax.random.normal(ks[3], (hidden,), jnp.float32),
      "g_w1": scale * jax.random.normal(ks[4], (hidden, num_feat_g), jnp.float32),
      "g_b1": scale * jax.random.normal(ks[5], (hidden,), jnp.float32),
      "g_w2": scale * jax.random.normal(ks[6], (hidden, hidden), jnp.float32),
      "g_b2": scale * jax.random.normal(ks[7], (hidden,), jnp.float32),
      "lin_w": scale * jax.random.normal(
          ks[8], (hidden, num_subvertices * hidden), jnp.float32),
      "lin_b": scale * jax.random.normal(ks[9], (hidden,), jnp.float32),
  }


def multiview_encoder_forward(params, x_c, x_g, edge_index_c, edge_index_g,
                              num_subvertices):
  """Mirrors MultiviewEncoder.forward: returns (Z, Z_c, Z_g, gene_embeddings)."""
  a_hat_g = gcn_norm_adj(edge_index_g, x_g.shape[0])
  a_hat_c = gcn_norm_adj(edge_index_c, x_c.shape[0])
  z, z_c, z_g, gene_embeddings = multiview_encoder_pallas(
      params, a_hat_c, a_hat_g, x_c, x_g, num_subvertices)
  assert z.shape[1] == 2 * z_g.shape[1]
  return z, z_c, z_g, gene_embeddings


# Pure-JAX f32 reference (for correctness check against the bf16 kernel).
def _reference_forward(params, a_c, a_g, x_c, x_g, num_subvertices):
  def gcn2(a, x, w1, b1, w2, b2):
    h = jnp.maximum(a @ (x @ w1.T) + b1, 0.0)
    return a @ (h @ w2.T) + b2
  emb = gcn2(a_g, x_g, params["g_w1"], params["g_b1"],
             params["g_w2"], params["g_b2"])
  flat = emb.reshape(emb.shape[0] // num_subvertices,
                     emb.shape[1] * num_subvertices)
  z_g = flat @ params["lin_w"].T + params["lin_b"]
  z_c = gcn2(a_c, x_c, params["c_w1"], params["c_b1"],
             params["c_w2"], params["c_b2"])
  z = jnp.concatenate([z_c, z_g], axis=1)
  return z, z_c, z_g, emb


# ----------------------------------------------------------------------------
# Main
# ----------------------------------------------------------------------------
if __name__ == "__main__":
  key = jax.random.PRNGKey(0)
  k_xc, k_xg, k_p = jax.random.split(key, 3)

  hidden = 32
  num_feat_c = 16           # cell node features
  num_feat_g = 16           # gene node features
  num_vertices = 8          # cells == gene "super-vertices"
  num_subvertices = 4       # gene sub-vertices per vertex
  num_cells = num_vertices
  num_gene_nodes = num_vertices * num_subvertices   # 32

  x_c = jax.random.normal(k_xc, (num_cells, num_feat_c), jnp.float32)
  x_g = jax.random.normal(k_xg, (num_gene_nodes, num_feat_g), jnp.float32)

  def ring_edges(n):
    i = jnp.arange(n, dtype=jnp.int32)
    j = (i + 1) % n
    return jnp.stack([jnp.concatenate([i, j]), jnp.concatenate([j, i])], axis=0)

  edge_index_c = ring_edges(num_cells)        # (2, 16)
  edge_index_g = ring_edges(num_gene_nodes)   # (2, 64)

  params = init_params(k_p, num_feat_c, num_feat_g, hidden, num_subvertices)

  z, z_c, z_g, gene_embeddings = multiview_encoder_forward(
      params, x_c, x_g, edge_index_c, edge_index_g, num_subvertices)
  jax.block_until_ready((z, z_c, z_g, gene_embeddings))

  # shape checks
  assert z.shape == (num_cells, 2 * hidden)
  assert z_c.shape == (num_cells, hidden)
  assert z_g.shape == (num_vertices, hidden)
  assert gene_embeddings.shape == (num_gene_nodes, hidden)

  # numerical check vs. pure-JAX f32 reference (loose tol: kernel uses bf16 MXU)
  a_hat_g = gcn_norm_adj(edge_index_g, num_gene_nodes)
  a_hat_c = gcn_norm_adj(edge_index_c, num_cells)
  z_r, zc_r, zg_r, emb_r = _reference_forward(
      params, a_hat_c, a_hat_g, x_c, x_g, num_subvertices)
  assert jnp.allclose(z, z_r, atol=5e-2, rtol=5e-2)
  assert jnp.allclose(gene_embeddings, emb_r, atol=5e-2, rtol=5e-2)

  print("KERNEL_OK")
</pallas_src>

<mosaic_0001>
module attributes {stable_mosaic.version = 11 : i64} {
  func.func @fused_multiview_kernel(%arg0: i32, %arg1: memref<32x32xbf16, #tpu.memory_space<vmem>>, %arg2: memref<32x128xbf16, #tpu.memory_space<vmem>>, %arg3: memref<128x128xbf16, #tpu.memory_space<vmem>>, %arg4: memref<8x8xbf16, #tpu.memory_space<vmem>>, %arg5: memref<8x128xbf16, #tpu.memory_space<vmem>>, %arg6: memref<128x128xbf16, #tpu.memory_space<vmem>>, %arg7: memref<6x128x128xbf16, #tpu.memory_space<vmem>>, %arg8: memref<5x128xf32, #tpu.memory_space<vmem>>, %arg9: memref<8x256xf32, #tpu.memory_space<vmem>>, %arg10: memref<32x128xf32, #tpu.memory_space<vmem>>) attributes {dimension_semantics = [#tpu.dimension_semantics<arbitrary>], iteration_bounds = array<i64: 1>, scalar_prefetch = 0 : i64, scratch_operands = 0 : i64, tpu.core_type = #tpu.core_type<tc>, window_params = [{pipeline_mode = #tpu.pipeline_mode<synchronous>, transform_indices = @transform_0, window_bounds = array<i64: 32, 32>}, {pipeline_mode = #tpu.pipeline_mode<synchronous>, transform_indices = @transform_1, window_bounds = array<i64: 32, 128>}, {pipeline_mode = #tpu.pipeline_mode<synchronous>, transform_indices = @transform_2, window_bounds = array<i64: 128, 128>}, {pipeline_mode = #tpu.pipeline_mode<synchronous>, transform_indices = @transform_3, window_bounds = array<i64: 8, 8>}, {pipeline_mode = #tpu.pipeline_mode<synchronous>, transform_indices = @transform_4, window_bounds = array<i64: 8, 128>}, {pipeline_mode = #tpu.pipeline_mode<synchronous>, transform_indices = @transform_5, window_bounds = array<i64: 128, 128>}, {pipeline_mode = #tpu.pipeline_mode<synchronous>, transform_indices = @transform_6, window_bounds = array<i64: 6, 128, 128>}, {pipeline_mode = #tpu.pipeline_mode<synchronous>, transform_indices = @transform_7, window_bounds = array<i64: 5, 128>}, {pipeline_mode = #tpu.pipeline_mode<synchronous>, transform_indices = @transform_8, window_bounds = array<i64: 8, 256>}, {pipeline_mode = #tpu.pipeline_mode<synchronous>, transform_indices = @transform_9, window_bounds = array<i64: 32, 128>}]} {
    %c0 = arith.constant 0 : index
    %c0_0 = arith.constant 0 : index
    %0 = vector.load %arg1[%c0, %c0_0] : memref<32x32xbf16, #tpu.memory_space<vmem>>, vector<32x32xbf16>
    %c0_1 = arith.constant 0 : index
    %c0_2 = arith.constant 0 : index
    %1 = vector.load %arg2[%c0_1, %c0_2] : memref<32x128xbf16, #tpu.memory_space<vmem>>, vector<32x128xbf16>
    %c0_3 = arith.constant 0 : index
    %c0_4 = arith.constant 0 : index
    %2 = vector.load %arg3[%c0_3, %c0_4] : memref<128x128xbf16, #tpu.memory_space<vmem>>, vector<128x128xbf16>
    %c0_5 = arith.constant 0 : index
    %c0_6 = arith.constant 0 : index
    %3 = vector.load %arg8[%c0_5, %c0_6] : memref<5x128xf32, #tpu.memory_space<vmem>>, vector<1x128xf32>
    %c0_7 = arith.constant 0 : index
    %c0_8 = arith.constant 0 : index
    %c0_9 = arith.constant 0 : index
    %4 = vector.load %arg7[%c0_7, %c0_8, %c0_9] : memref<6x128x128xbf16, #tpu.memory_space<vmem>>, vector<1x128x128xbf16>
    %5 = vector.shape_cast %4 : vector<1x128x128xbf16> to vector<128x128xbf16>
    %c1 = arith.constant 1 : index
    %c0_10 = arith.constant 0 : index
    %6 = vector.load %arg8[%c1, %c0_10] : memref<5x128xf32, #tpu.memory_space<vmem>>, vector<1x128xf32>
    %cst = arith.constant dense<0.000000e+00> : vector<32x128xf32>
    %7 = tpu.matmul %0, %1, %cst {dimension_numbers = #tpu.dot_dimension_numbers<[1], [0], [0], [1], [0, 0, 1, 1], [], []>} : vector<32x32xbf16>, vector<32x128xbf16>, vector<32x128xf32> -> vector<32x128xf32>
    %8 = arith.truncf %7 : vector<32x128xf32> to vector<32x128xbf16>
    %cst_11 = arith.constant dense<0.000000e+00> : vector<32x128xf32>
    %9 = tpu.matmul %8, %2, %cst_11 {dimension_numbers = #tpu.dot_dimension_numbers<[1], [0], [0], [1], [0, 0, 1, 1], [], []>} : vector<32x128xbf16>, vector<128x128xbf16>, vector<32x128xf32> -> vector<32x128xf32>
    %10 = vector.broadcast %3 : vector<1x128xf32> to vector<32x128xf32>
    %11 = arith.addf %9, %10 : vector<32x128xf32>
    %cst_12 = arith.constant 0.000000e+00 : f32
    %12 = vector.broadcast %cst_12 : f32 to vector<32x128xf32>
    %13 = arith.maximumf %11, %12 : vector<32x128xf32>
    %14 = arith.truncf %13 : vector<32x128xf32> to vector<32x128xbf16>
    %cst_13 = arith.constant dense<0.000000e+00> : vector<32x128xf32>
    %15 = tpu.matmul %14, %5, %cst_13 {dimension_numbers = #tpu.dot_dimension_numbers<[1], [0], [0], [1], [0, 0, 1, 1], [], []>} : vector<32x128xbf16>, vector<128x128xbf16>, vector<32x128xf32> -> vector<32x128xf32>
    %16 = arith.truncf %15 : vector<32x128xf32> to vector<32x128xbf16>
    %cst_14 = arith.constant dense<0.000000e+00> : vector<32x128xf32>
    %17 = tpu.matmul %0, %16, %cst_14 {dimension_numbers = #tpu.dot_dimension_numbers<[1], [0], [0], [1], [0, 0, 1, 1], [], []>} : vector<32x32xbf16>, vector<32x128xbf16>, vector<32x128xf32> -> vector<32x128xf32>
    %18 = vector.broadcast %6 : vector<1x128xf32> to vector<32x128xf32>
    %19 = arith.addf %17, %18 : vector<32x128xf32>
    %c0_15 = arith.constant 0 : index
    %c0_16 = arith.constant 0 : index
    %20 = vector.load %arg10[%c0_15, %c0_16] : memref<32x128xf32, #tpu.memory_space<vmem>>, vector<32x128xf32>
    tpu.vector_store %arg10[%c0_15, %c0_16], %19 {strides = array<i32>} : memref<32x128xf32, #tpu.memory_space<vmem>>, vector<32x128xf32>,
    %c4 = arith.constant 4 : index
    %c0_17 = arith.constant 0 : index
    %21 = vector.load %arg8[%c4, %c0_17] : memref<5x128xf32, #tpu.memory_space<vmem>>, vector<1x128xf32>
    %c0_18 = arith.constant 0 : index
    %c0_19 = arith.constant 0 : index
    %22 = tpu.strided_load %arg10[%c0_18, %c0_19] {strides = array<i32: 4, 1>} : memref<32x128xf32, #tpu.memory_space<vmem>>, vector<8x128xf32>
    %23 = arith.truncf %22 : vector<8x128xf32> to vector<8x128xbf16>
    %c2 = arith.constant 2 : index
    %c0_20 = arith.constant 0 : index
    %c0_21 = arith.constant 0 : index
    %24 = vector.load %arg7[%c2, %c0_20, %c0_21] : memref<6x128x128xbf16, #tpu.memory_space<vmem>>, vector<1x128x128xbf16>
    %25 = vector.shape_cast %24 : vector<1x128x128xbf16> to vector<128x128xbf16>
    %cst_22 = arith.constant dense<0.000000e+00> : vector<8x128xf32>
    %26 = tpu.matmul %23, %25, %cst_22 {dimension_numbers = #tpu.dot_dimension_numbers<[1], [0], [0], [1], [0, 0, 1, 1], [], []>} : vector<8x128xbf16>, vector<128x128xbf16>, vector<8x128xf32> -> vector<8x128xf32>
    %27 = vector.broadcast %21 : vector<1x128xf32> to vector<8x128xf32>
    %28 = arith.addf %27, %26 : vector<8x128xf32>
    %c1_23 = arith.constant 1 : index
    %c0_24 = arith.constant 0 : index
    %29 = tpu.strided_load %arg10[%c1_23, %c0_24] {strides = array<i32: 4, 1>} : memref<32x128xf32, #tpu.memory_space<vmem>>, vector<8x128xf32>
    %30 = arith.truncf %29 : vector<8x128xf32> to vector<8x128xbf16>
    %c3 = arith.constant 3 : index
    %c0_25 = arith.constant 0 : index
    %c0_26 = arith.constant 0 : index
    %31 = vector.load %arg7[%c3, %c0_25, %c0_26] : memref<6x128x128xbf16, #tpu.memory_space<vmem>>, vector<1x128x128xbf16>
    %32 = vector.shape_cast %31 : vector<1x128x128xbf16> to vector<128x128xbf16>
    %cst_27 = arith.constant dense<0.000000e+00> : vector<8x128xf32>
    %33 = tpu.matmul %30, %32, %cst_27 {dimension_numbers = #tpu.dot_dimension_numbers<[1], [0], [0], [1], [0, 0, 1, 1], [], []>} : vector<8x128xbf16>, vector<128x128xbf16>, vector<8x128xf32> -> vector<8x128xf32>
    %34 = arith.addf %28, %33 : vector<8x128xf32>
    %c2_28 = arith.constant 2 : index
    %c0_29 = arith.constant 0 : index
    %35 = tpu.strided_load %arg10[%c2_28, %c0_29] {strides = array<i32: 4, 1>} : memref<32x128xf32, #tpu.memory_space<vmem>>, vector<8x128xf32>
    %36 = arith.truncf %35 : vector<8x128xf32> to vector<8x128xbf16>
    %c4_30 = arith.constant 4 : index
    %c0_31 = arith.constant 0 : index
    %c0_32 = arith.constant 0 : index
    %37 = vector.load %arg7[%c4_30, %c0_31, %c0_32] : memref<6x128x128xbf16, #tpu.memory_space<vmem>>, vector<1x128x128xbf16>
    %38 = vector.shape_cast %37 : vector<1x128x128xbf16> to vector<128x128xbf16>
    %cst_33 = arith.constant dense<0.000000e+00> : vector<8x128xf32>
    %39 = tpu.matmul %36, %38, %cst_33 {dimension_numbers = #tpu.dot_dimension_numbers<[1], [0], [0], [1], [0, 0, 1, 1], [], []>} : vector<8x128xbf16>, vector<128x128xbf16>, vector<8x128xf32> -> vector<8x128xf32>
    %40 = arith.addf %34, %39 : vector<8x128xf32>
    %c3_34 = arith.constant 3 : index
    %c0_35 = arith.constant 0 : index
    %41 = tpu.strided_load %arg10[%c3_34, %c0_35] {strides = array<i32: 4, 1>} : memref<32x128xf32, #tpu.memory_space<vmem>>, vector<8x128xf32>
    %42 = arith.truncf %41 : vector<8x128xf32> to vector<8x128xbf16>
    %c5 = arith.constant 5 : index
    %c0_36 = arith.constant 0 : index
    %c0_37 = arith.constant 0 : index
    %43 = vector.load %arg7[%c5, %c0_36, %c0_37] : memref<6x128x128xbf16, #tpu.memory_space<vmem>>, vector<1x128x128xbf16>
    %44 = vector.shape_cast %43 : vector<1x128x128xbf16> to vector<128x128xbf16>
    %cst_38 = arith.constant dense<0.000000e+00> : vector<8x128xf32>
    %45 = tpu.matmul %42, %44, %cst_38 {dimension_numbers = #tpu.dot_dimension_numbers<[1], [0], [0], [1], [0, 0, 1, 1], [], []>} : vector<8x128xbf16>, vector<128x128xbf16>, vector<8x128xf32> -> vector<8x128xf32>
    %46 = arith.addf %40, %45 : vector<8x128xf32>
    %c0_39 = arith.constant 0 : index
    %c0_40 = arith.constant 0 : index
    %47 = vector.load %arg4[%c0_39, %c0_40] : memref<8x8xbf16, #tpu.memory_space<vmem>>, vector<8x8xbf16>
    %c0_41 = arith.constant 0 : index
    %c0_42 = arith.constant 0 : index
    %48 = vector.load %arg5[%c0_41, %c0_42] : memref<8x128xbf16, #tpu.memory_space<vmem>>, vector<8x128xbf16>
    %c0_43 = arith.constant 0 : index
    %c0_44 = arith.constant 0 : index
    %49 = vector.load %arg6[%c0_43, %c0_44] : memref<128x128xbf16, #tpu.memory_space<vmem>>, vector<128x128xbf16>
    %c2_45 = arith.constant 2 : index
    %c0_46 = arith.constant 0 : index
    %50 = vector.load %arg8[%c2_45, %c0_46] : memref<5x128xf32, #tpu.memory_space<vmem>>, vector<1x128xf32>
    %c1_47 = arith.constant 1 : index
    %c0_48 = arith.constant 0 : index
    %c0_49 = arith.constant 0 : index
    %51 = vector.load %arg7[%c1_47, %c0_48, %c0_49] : memref<6x128x128xbf16, #tpu.memory_space<vmem>>, vector<1x128x128xbf16>
    %52 = vector.shape_cast %51 : vector<1x128x128xbf16> to vector<128x128xbf16>
    %c3_50 = arith.constant 3 : index
    %c0_51 = arith.constant 0 : index
    %53 = vector.load %arg8[%c3_50, %c0_51] : memref<5x128xf32, #tpu.memory_space<vmem>>, vector<1x128xf32>
    %cst_52 = arith.constant dense<0.000000e+00> : vector<8x128xf32>
    %54 = tpu.matmul %47, %48, %cst_52 {dimension_numbers = #tpu.dot_dimension_numbers<[1], [0], [0], [1], [0, 0, 1, 1], [], []>} : vector<8x8xbf16>, vector<8x128xbf16>, vector<8x128xf32> -> vector<8x128xf32>
    %55 = arith.truncf %54 : vector<8x128xf32> to vector<8x128xbf16>
    %cst_53 = arith.constant dense<0.000000e+00> : vector<8x128xf32>
    %56 = tpu.matmul %55, %49, %cst_53 {dimension_numbers = #tpu.dot_dimension_numbers<[1], [0], [0], [1], [0, 0, 1, 1], [], []>} : vector<8x128xbf16>, vector<128x128xbf16>, vector<8x128xf32> -> vector<8x128xf32>
    %57 = vector.broadcast %50 : vector<1x128xf32> to vector<8x128xf32>
    %58 = arith.addf %56, %57 : vector<8x128xf32>
    %cst_54 = arith.constant 0.000000e+00 : f32
    %59 = vector.broadcast %cst_54 : f32 to vector<8x128xf32>
    %60 = arith.maximumf %58, %59 : vector<8x128xf32>
    %61 = arith.truncf %60 : vector<8x128xf32> to vector<8x128xbf16>
    %cst_55 = arith.constant dense<0.000000e+00> : vector<8x128xf32>
    %62 = tpu.matmul %61, %52, %cst_55 {dimension_numbers = #tpu.dot_dimension_numbers<[1], [0], [0], [1], [0, 0, 1, 1], [], []>} : vector<8x128xbf16>, vector<128x128xbf16>, vector<8x128xf32> -> vector<8x128xf32>
    %63 = arith.truncf %62 : vector<8x128xf32> to vector<8x128xbf16>
    %cst_56 = arith.constant dense<0.000000e+00> : vector<8x128xf32>
    %64 = tpu.matmul %47, %63, %cst_56 {dimension_numbers = #tpu.dot_dimension_numbers<[1], [0], [0], [1], [0, 0, 1, 1], [], []>} : vector<8x8xbf16>, vector<8x128xbf16>, vector<8x128xf32> -> vector<8x128xf32>
    %65 = vector.broadcast %53 : vector<1x128xf32> to vector<8x128xf32>
    %66 = arith.addf %64, %65 : vector<8x128xf32>
    %c0_57 = arith.constant 0 : index
    %c0_58 = arith.constant 0 : index
    %67 = vector.load %arg9[%c0_57, %c0_58] : memref<8x256xf32, #tpu.memory_space<vmem>>, vector<8x128xf32>
    tpu.vector_store %arg9[%c0_57, %c0_58], %66 {strides = array<i32>} : memref<8x256xf32, #tpu.memory_space<vmem>>, vector<8x128xf32>,
    %c0_59 = arith.constant 0 : index
    %c128 = arith.constant 128 : index
    %68 = vector.load %arg9[%c0_59, %c128] : memref<8x256xf32, #tpu.memory_space<vmem>>, vector<8x128xf32>
    tpu.vector_store %arg9[%c0_59, %c128], %46 {strides = array<i32>} : memref<8x256xf32, #tpu.memory_space<vmem>>, vector<8x128xf32>,
    return
  }
  func.func @transform_0(%arg0: i32) -> (i32, i32) {
    %c0_i32 = arith.constant 0 : i32
    %c0_i32_0 = arith.constant 0 : i32
    %c0_i32_1 = arith.constant 0 : i32
    return %c0_i32, %c0_i32_0 : i32, i32
  }
  func.func @transform_1(%arg0: i32) -> (i32, i32) {
    %c0_i32 = arith.constant 0 : i32
    %c0_i32_0 = arith.constant 0 : i32
    %c0_i32_1 = arith.constant 0 : i32
    return %c0_i32, %c0_i32_0 : i32, i32
  }
  func.func @transform_2(%arg0: i32) -> (i32, i32) {
    %c0_i32 = arith.constant 0 : i32
    %c0_i32_0 = arith.constant 0 : i32
    %c0_i32_1 = arith.constant 0 : i32
    return %c0_i32, %c0_i32_0 : i32, i32
  }
  func.func @transform_3(%arg0: i32) -> (i32, i32) {
    %c0_i32 = arith.constant 0 : i32
    %c0_i32_0 = arith.constant 0 : i32
    %c0_i32_1 = arith.constant 0 : i32
    return %c0_i32, %c0_i32_0 : i32, i32
  }
  func.func @transform_4(%arg0: i32) -> (i32, i32) {
    %c0_i32 = arith.constant 0 : i32
    %c0_i32_0 = arith.constant 0 : i32
    %c0_i32_1 = arith.constant 0 : i32
    return %c0_i32, %c0_i32_0 : i32, i32
  }
  func.func @transform_5(%arg0: i32) -> (i32, i32) {
    %c0_i32 = arith.constant 0 : i32
    %c0_i32_0 = arith.constant 0 : i32
    %c0_i32_1 = arith.constant 0 : i32
    return %c0_i32, %c0_i32_0 : i32, i32
  }
  func.func @transform_6(%arg0: i32) -> (i32, i32, i32) {
    %c0_i32 = arith.constant 0 : i32
    %c0_i32_0 = arith.constant 0 : i32
    %c0_i32_1 = arith.constant 0 : i32
    %c0_i32_2 = arith.constant 0 : i32
    return %c0_i32, %c0_i32_0, %c0_i32_1 : i32, i32, i32
  }
  func.func @transform_7(%arg0: i32) -> (i32, i32) {
    %c0_i32 = arith.constant 0 : i32
    %c0_i32_0 = arith.constant 0 : i32
    %c0_i32_1 = arith.constant 0 : i32
    return %c0_i32, %c0_i32_0 : i32, i32
  }
  func.func @transform_8(%arg0: i32) -> (i32, i32) {
    %c0_i32 = arith.constant 0 : i32
    %c0_i32_0 = arith.constant 0 : i32
    %c0_i32_1 = arith.constant 0 : i32
    return %c0_i32, %c0_i32_0 : i32, i32
  }
  func.func @transform_9(%arg0: i32) -> (i32, i32) {
    %c0_i32 = arith.constant 0 : i32
    %c0_i32_0 = arith.constant 0 : i32
    %c0_i32_1 = arith.constant 0 : i32
    return %c0_i32, %c0_i32_0 : i32, i32
  }
}

</mosaic_0001>

<bundles_post_ra>
// kernel: tpu_custom_call.1
= control target key start
LH: loop header
LB: loop body
LE: loop exit
PB: predicated region body
PF: predicated region fallthrough
CT: control target
= control target key end

     0   :  { %15 = vsyncpa [#allocation3], 0  ;;  %s2101_s0 = inlined_call_operand.hbm [shape: bf16[32,32], index: 0, kind: input, shape index: {}]   ;;  %s2102_s1 = inlined_call_operand.hbm [shape: bf16[32,128], index: 1, kind: input, shape index: {}]   ;;  %s2103_s2 = inlined_call_operand.hbm [shape: bf16[128,128], index: 2, kind: input, shape index: {}]   ;;  %s2104_s3 = inlined_call_operand.vmem [shape: bf16[8,8], index: 3, kind: input, shape index: {}]   ;;  %s2105_s4 = inlined_call_operand.hbm [shape: bf16[8,128], index: 4, kind: input, shape index: {}]   ;;  %s2106_s5 = inlined_call_operand.hbm [shape: bf16[128,128], index: 5, kind: input, shape index: {}]   ;;  %s2107_s6 = inlined_call_operand.hbm [shape: bf16[6,128,128], index: 6, kind: input, shape index: {}]   ;;  %s2108_s7 = inlined_call_operand.vmem [shape: f32[5,128], index: 7, kind: input, shape index: {}]   ;;  %s2109_s8 = inlined_call_operand.hbm [shape: f32[8,256], index: 8, kind: output, shape index: {0}]   ;;  %s2110_s9 = inlined_call_operand.hbm [shape: f32[32,128], index: 9, kind: output, shape index: {1}]  }
   0x1   :  { %16 = vsyncpa [#allocation6], 0 }
   0x2   :  { %17 = vsyncpa [#allocation9], 0 }
   0x3   :  { %18 = vsyncpa [#allocation12], 0 }
   0x4   :  { %19 = vsyncpa [#allocation4], 0 }
   0x5   :  { %20 = vsyncpa [#allocation15], 0  ;;  %s1898_s30 = smov [#allocation5]   ;;  %s1899_s11 = smov [#allocation8]  }
   0x6   :  { %s38_s10 = sshll.u32 %s1898_s30, 4  ;;  %s65_s12 = sshll.u32 %s1899_s11, 4  ;;  %s39_s10 = int_to_ptr.vmem [resolvable:$true] %s38_s10  ;;  %s66_s12 = int_to_ptr.vmem [resolvable:$true] %s65_s12 }
   0x7   :  { %s1734_s13 = scalar_lea.vmem %s39_s10, 256  ;;  %p1739_p1 = scmp.lt.s32.totalorder %s39_s10, %s39_s10 }
   0x8   :  { %p1735_p0 = scmp.ne.s32.totalorder %s39_s10, %s1734_s13  ;;  %p1740_p2 = scmp.lt.s32.totalorder %s1734_s13, %s1734_s13 }
   0xa   :  { %p1741_p3 = por %p1740_p2, %p1739_p1 }
   0xc   :  { %p1742_p4 = pnand %p1741_p3, %p1735_p0 }
   0xe   :  { %1745 = shalt.err (!%p1742_p4)
}
   0xf   :  { %s1900_s14 = smov 64   ;;  %s1901_s15 = smov 4  }
  0x10   :  { %44 = dma.hbm_to_vmem [thread:$0]  %s2102_s1, 256, %s39_s10, [#allocation6], %s1900_s14, %s1900_s14, %s1901_s15  }
  0x11   :  { %s1754_s18 = scalar_lea.vmem %s66_s12, 64  ;;  %p1759_p6 = scmp.lt.s32.totalorder %s66_s12, %s66_s12 }
  0x12   :  { %p1755_p5 = scmp.ne.s32.totalorder %s66_s12, %s1754_s18  ;;  %p1760_p7 = scmp.lt.s32.totalorder %s1754_s18, %s1754_s18 }
  0x14   :  { %p1761_p8 = por %p1760_p7, %p1759_p6 }
  0x16   :  { %p1762_p9 = pnand %p1761_p8, %p1755_p5 }
  0x18   :  { %1765 = shalt.err (!%p1762_p9)
}
  0x19   :  { %68 = dma.hbm_to_vmem [thread:$0]  %s2105_s4, 64, %s66_s12, [#allocation9]  }
  0x1a   :  { %s1902_s21 = smov [#allocation2]   ;;  %s1903_s23 = smov [#allocation7]  }
  0x1b   :  { %s26_s22 = sshll.u32 %s1902_s21, 4  ;;  %s50_s24 = sshll.u32 %s1903_s23, 4  ;;  %s27_s22 = int_to_ptr.vmem [resolvable:$true] %s26_s22  ;;  %s51_s24 = int_to_ptr.vmem [resolvable:$true] %s50_s24 }
  0x1c   :  { %s1774_s25 = scalar_lea.vmem %s27_s22, 256  ;;  %p1779_p11 = scmp.lt.s32.totalorder %s27_s22, %s27_s22 }
  0x1d   :  { %p1775_p10 = scmp.ne.s32.totalorder %s27_s22, %s1774_s25  ;;  %p1780_p12 = scmp.lt.s32.totalorder %s1774_s25, %s1774_s25 }
  0x1f   :  { %p1781_p13 = por %p1780_p12, %p1779_p11 }
  0x21   :  { %p1782_p0 = pnand %p1781_p13, %p1775_p10 }
  0x23   :  { %1785 = shalt.err (!%p1782_p0)
}
  0x24   :  { %32 = dma.hbm_to_vmem [thread:$0]  %s2101_s0, 256, %s27_s22, [#allocation3], %s1900_s14, %s1900_s14, %s1901_s15  }
  0x25   :  { %s1794_s4 = scalar_lea.vmem %s51_s24, 1024  ;;  %p1799_p2 = scmp.lt.s32.totalorder %s51_s24, %s51_s24 }
  0x26   :  { %p1795_p1 = scmp.ne.s32.totalorder %s51_s24, %s1794_s4  ;;  %p1800_p3 = scmp.lt.s32.totalorder %s1794_s4, %s1794_s4 }
  0x28   :  { %p1801_p4 = por %p1800_p3, %p1799_p2 }
  0x2a   :  { %p1802_p5 = pnand %p1801_p4, %p1795_p1 }
  0x2c   :  { %1805 = shalt.err (!%p1802_p5)
}
  0x2d   :  { %56 = dma.hbm_to_vmem [thread:$0]  %s2103_s2, 1024, %s51_s24, [#allocation6], %s1900_s14, %s1900_s14, %s1901_s15  }
  0x2e   :  { %s1904_s29 = smov [#allocation10]   ;;  %s1905_s10 = smov [#allocation11]  }
  0x2f   :  { %s74_s30 = sshll.u32 %s1904_s29, 4  ;;  %s86_s11 = sshll.u32 %s1905_s10, 4  ;;  %s75_s30 = int_to_ptr.vmem [resolvable:$true] %s74_s30  ;;  %s87_s11 = int_to_ptr.vmem [resolvable:$true] %s86_s11 }
  0x30   :  { %s1814_s0 = scalar_lea.vmem %s75_s30, 1024  ;;  %p1819_p7 = scmp.lt.s32.totalorder %s75_s30, %s75_s30 }
  0x31   :  { %p1815_p6 = scmp.ne.s32.totalorder %s75_s30, %s1814_s0  ;;  %p1820_p8 = scmp.lt.s32.totalorder %s1814_s0, %s1814_s0 }
  0x33   :  { %p1821_p9 = por %p1820_p8, %p1819_p7 }
  0x35   :  { %p1822_p10 = pnand %p1821_p9, %p1815_p6 }
  0x37   :  { %1825 = shalt.err (!%p1822_p10)
}
  0x38   :  { %80 = dma.hbm_to_vmem [thread:$0]  %s2106_s5, 1024, %s75_s30, [#allocation9], %s1900_s14, %s1900_s14, %s1901_s15  }
  0x39   :  { %s1834_s2 = scalar_lea.vmem %s87_s11, 6144  ;;  %p1839_p12 = scmp.lt.s32.totalorder %s87_s11, %s87_s11 }
  0x3a   :  { %p1835_p11 = scmp.ne.s32.totalorder %s87_s11, %s1834_s2  ;;  %p1840_p13 = scmp.lt.s32.totalorder %s1834_s2, %s1834_s2 }
  0x3c   :  { %p1841_p0 = por %p1840_p13, %p1839_p12 }
  0x3e   :  { %p1842_p1 = pnand %p1841_p0, %p1835_p11 }
  0x40   :  { %1845 = shalt.err (!%p1842_p1)
}
  0x41   :  { %92 = dma.hbm_to_vmem [thread:$0]  %s2107_s6, 6144, %s87_s11, [#allocation12], %s1900_s14, %s1900_s14, %s1901_s15  }
  0x42   :  { %1886 = dma.done.wait [#allocation3], 256  }
  0x43   :  { %1887 = vsyncadd [#allocation3], 4294967040 }
  0x44   :  { %1888 = dma.done.wait [#allocation6], 1280  }
  0x45   :  { %1889 = vsyncadd [#allocation6], 4294966016 }
  0x46   :  { %1890 = dma.done.wait [#allocation9], 1088  }
  0x47   :  { %1891 = vsyncadd [#allocation9], 4294966208 }
  0x48   :  { %1892 = dma.done.wait [#allocation12], 6144  }
  0x49   :  { %1893 = vsyncadd [#allocation12], 4294961152  ;;  %v1658_v0 = vld [vmem:[#allocation5 + $0x8] sm:$0xff]   ;;  %v1659_v1 = vld [vmem:[#allocation5] sm:$0xff]   ;;  %vm178_vm0 = vcmask 261120   ;;  %v1906_v42 = vmov 0.0  }
  0x4a   :  { %1456 = vmatprep.subr.bf16.mxu0 %v1658_v0  ;;  %v1660_v2 = vld [vmem:[#allocation2] sm:$0xff]   ;;  %v1662_v3 = vld [vmem:[#allocation7 + $0x38] sm:$0xff]   ;;  %v1663_v4 = vld [vmem:[#allocation7 + $0x30] sm:$0xff]   ;;  %vm1907_vm1 = vmmov 0   ;;  %vm980_vm2 = vcmask 1043456   ;;  %vm976_vm3 = vcmask 64512  }
  0x4b   :  { %1457 = vmatpush3.bf16.msra.mxu0 %v1658_v0  ;;  %1460 = vmatprep.mubr.msk.bf16.mxu0 %vm178_vm0, %v1660_v2  ;;  %v1996_v5 = vld [vmem:[#allocation2 + $0x8] sm:$0xff]   ;;  %v1665_v7 = vld [vmem:[#allocation7 + $0x20] sm:$0xff]   ;;  %v1666_v8 = vld [vmem:[#allocation7 + $0x18] sm:$0xff]   ;;  %s1908_s23 = smov [#allocation14]  }
  0x4c   :  { %1458 = vmatprep.subr.bf16.mxu0 %v1659_v1  ;;  %1464 = vmatprep.subr.bf16.mxu1 %v1662_v3  ;;  %v1664_v6 = vld [vmem:[#allocation7 + $0x28] sm:$0xff]   ;;  %v1667_v9 = vld [vmem:[#allocation7 + $0x10] sm:$0xff]   ;;  %v1669_v11 = vld [vmem:[#allocation7] sm:$0xff]   ;;  %s1272_s24 = sshll.u32 %s1908_s23, 4  ;;  %s1273_s24 = int_to_ptr.vmem [resolvable:$true] %s1272_s24 }
  0x4d   :  { %1465 = vmatpush3.bf16.msra.mxu1 %v1662_v3  ;;  %v1668_v10 = vld [vmem:[#allocation7 + $0x8] sm:$0xff]   ;;  %v1670_v12 = vld [vmem:[#allocation11 + $0x38] sm:$0xff]   ;;  %v1671_v13 = vld [vmem:[#allocation11 + $0x30] sm:$0xff]   ;;  %s1846_s25 = scalar_lea.vmem %s1273_s24, 512  ;;  %p1851_p3 = scmp.lt.s32.totalorder %s1273_s24, %s1273_s24 }
  0x4e   :  { %1466 = vmatprep.subr.bf16.mxu1 %v1663_v4  ;;  %v1672_v14 = vld [vmem:[#allocation11 + $0x28] sm:$0xff]   ;;  %v1673_v15 = vld [vmem:[#allocation11 + $0x20] sm:$0xff]   ;;  %v1674_v16 = vld [vmem:[#allocation11 + $0x18] sm:$0xff]   ;;  %p1847_p2 = scmp.ne.s32.totalorder %s1273_s24, %s1846_s25  ;;  %p1852_p4 = scmp.lt.s32.totalorder %s1846_s25, %s1846_s25 }
  0x4f   :  { %1459 = vmatpush3.bf16.msra.mxu0 %v1659_v1  ;;  %v1675_v23 = vld [vmem:[#allocation11 + $0x10] sm:$0xff]   ;;  %v1676_v24 = vld [vmem:[#allocation11 + $0x8] sm:$0xff]   ;;  %v1677_v25 = vld [vmem:[#allocation11] sm:$0xff]  }
  0x50   :  { %1484 = vmatprep.subr.bf16.mxu0 %v1670_v12  ;;  %v1297_v28 = vld [vmem:[%s2108_s7] ss:$0 sm:$0xff]  ;;  %v1680_v43 = vld [vmem:[#allocation11 + $0xb0] sm:$0xff]   ;;  %v1682_v44 = vld [vmem:[#allocation11 + $0xa8] sm:$0xff]   ;;  %p1853_p5 = por %p1852_p4, %p1851_p3 }
  0x51   :  { %1467 = vmatpush3.bf16.msra.mxu1 %v1663_v4  ;;  %v1678_v41 = vld [vmem:[#allocation11 + $0xb8] sm:$0xff]   ;;  %v1684_v45 = vld [vmem:[#allocation11 + $0xa0] sm:$0xff]   ;;  %v1681_v53 = vld [vmem:[#allocation11 + $0xf0] sm:$0xff]  }
  0x52   :  { %1461 = vmatmul.mubr.msk.bf16.vlgmr.msra.gmra.mxu0 %vm178_vm0, %v1996_v5  ;;  %1468 = vmatprep.subr.bf16.mxu1 %v1664_v6  ;;  %v1679_v52 = vld [vmem:[#allocation11 + $0xf8] sm:$0xff]   ;;  %v1683_v54 = vld [vmem:[#allocation11 + $0xe8] sm:$0xff]   ;;  %v1685_v55 = vld [vmem:[#allocation11 + $0xe0] sm:$0xff]   ;;  %p1854_p6 = pnand %p1853_p5, %p1847_p2 }
  0x53   :  { %1485 = vmatpush3.bf16.msra.mxu0 %v1670_v12  ;;  %v1686_v56 = vld [vmem:[#allocation11 + $0x98] sm:$0xff]   ;;  %v1688_v58 = vld [vmem:[#allocation11 + $0x90] sm:$0xff]   ;;  %v1690_v60 = vld [vmem:[#allocation11 + $0x88] sm:$0xff]  }
  0x54   :  { %1486 = vmatprep.subr.bf16.mxu0 %v1671_v13  ;;  %v1687_v57 = vld [vmem:[#allocation11 + $0xd8] sm:$0xff]   ;;  %v1689_v59 = vld [vmem:[#allocation11 + $0xd0] sm:$0xff]   ;;  %v1691_v61 = vld [vmem:[#allocation11 + $0xc8] sm:$0xff]  }
  0x55   :  { %1469 = vmatpush3.bf16.msra.mxu1 %v1664_v6  ;;  %v1692_v62 = vld [vmem:[#allocation11 + $0x80] sm:$0xff]   ;;  %v1314_v0 = vld [vmem:[%s2108_s7 + $0x1] ss:$0 sm:$0xff] }
  0x56   :  { %1470 = vmatprep.subr.bf16.mxu1 %v1665_v7  ;;  %v1693_v63 = vld [vmem:[#allocation11 + $0xc0] sm:$0xff]   ;;  %v1695_v12 = vld [vmem:[#allocation11 + $0x178] sm:$0xff]  }
  0x57   :  { %1487 = vmatpush3.bf16.msra.mxu0 %v1671_v13 }
  0x58   :  { %1488 = vmatprep.subr.bf16.mxu0 %v1672_v14 }
  0x59   :  { %1471 = vmatpush3.bf16.msra.mxu1 %v1665_v7 }
  0x5a   :  { %1472 = vmatprep.subr.bf16.mxu1 %v1666_v8 }
  0x5b   :  { %1489 = vmatpush3.bf16.msra.mxu0 %v1672_v14 }
  0x5c   :  { %1490 = vmatprep.subr.bf16.mxu0 %v1673_v15 }
  0x5d   :  { %1473 = vmatpush3.bf16.msra.mxu1 %v1666_v8 }
  0x5e   :  { %1474 = vmatprep.subr.bf16.mxu1 %v1667_v9 }
  0x5f   :  { %1491 = vmatpush3.bf16.msra.mxu0 %v1673_v15  ;;  %v1696_v15 = vld [vmem:[#allocation11 + $0x130] sm:$0xff]  }
  0x60   :  { %1492 = vmatprep.subr.bf16.mxu0 %v1674_v16 }
  0x61   :  { %1475 = vmatpush3.bf16.msra.mxu1 %v1667_v9  ;;  %v1694_v9 = vld [vmem:[#allocation11 + $0x138] sm:$0xff]  }
  0x62   :  { %1476 = vmatprep.subr.bf16.mxu1 %v1668_v10 }
  0x63   :  { %1493 = vmatpush3.bf16.msra.mxu0 %v1674_v16  ;;  %v1697_v16 = vld [vmem:[#allocation11 + $0x170] sm:$0xff]  }
  0x64   :  { %1494 = vmatprep.subr.bf16.mxu0 %v1675_v23 }
  0x65   :  { %1477 = vmatpush3.bf16.msra.mxu1 %v1668_v10 }
  0x66   :  { %1478 = vmatprep.subr.bf16.mxu1 %v1669_v11 }
  0x67   :  { %1495 = vmatpush3.bf16.msra.mxu0 %v1675_v23  ;;  %v1704_v23 = vld [vmem:[#allocation11 + $0x110] sm:$0xff]  }
  0x68   :  { %1496 = vmatprep.subr.bf16.mxu0 %v1676_v24 }
  0x69   :  { %1479 = vmatpush3.bf16.msra.mxu1 %v1669_v11 }
  0x6b   :  { %1497 = vmatpush3.bf16.msra.mxu0 %v1676_v24  ;;  %v1705_v24 = vld [vmem:[#allocation11 + $0x150] sm:$0xff]  }
  0x6c   :  { %1498 = vmatprep.subr.bf16.mxu0 %v1677_v25 }
  0x6f   :  { %1499 = vmatpush3.bf16.msra.mxu0 %v1677_v25  ;;  %v1706_v25 = vld [vmem:[#allocation11 + $0x108] sm:$0xff]  }
  0x70   :  { %1512 = vmatprep.subr.bf16.mxu0 %v1906_v42 }
 0x112   :  { %v1462_v17 = vpop.f32.mrf.mxu0 }
 0x114   :  { %v219_v18 = vpop.f32.mrf.mxu0 }
 0x116   :  { %v1463_v19 = vpop.f32.mrf.mxu0 }
 0x117   :  { %v235_v22 = vpack.c.bf16 %v1463_v19, %v1462_v17  ;;  %v1698_v17 = vld [vmem:[#allocation11 + $0x128] sm:$0xff]   ;;  %v1700_v19 = vld [vmem:[#allocation11 + $0x120] sm:$0xff]  }
 0x118   :  { %v222_v20 = vpop.f32.mrf.mxu0 }
 0x119   :  { %v234_v21 = vpack.c.bf16 %v222_v20, %v219_v18  ;;  %v1699_v18 = vld [vmem:[#allocation11 + $0x168] sm:$0xff]   ;;  %v1701_v20 = vld [vmem:[#allocation11 + $0x160] sm:$0xff]  }
 0x11b   :  { %1480 = vmatprep.mubr.bf16.mxu1 %v234_v21  ;;  %v1702_v21 = vld [vmem:[#allocation11 + $0x118] sm:$0xff]  }
 0x11c   :  { %1481 = vmatmul.mubr.bf16.vlgmr.msra.gmra.mxu1 %v235_v22  ;;  %v1703_v22 = vld [vmem:[#allocation11 + $0x158] sm:$0xff]  }
 0x11d   :  { %1508 = vmatprep.mubr.msk.bf16.mxu1 %vm178_vm0, %v1660_v2 }
 0x1dc   :  { %v1482_v26 = vpop.f32.mrf.mxu1 }
 0x1dd   :  { %v331_v32 = vadd.f32 %v1482_v26, %v1297_v28  ;;  %v1707_v26 = vld [vmem:[#allocation11 + $0x148] sm:$0xff]  }
 0x1de   :  { %v322_v27 = vpop.f32.mrf.mxu1 }
 0x1df   :  { %v323_v30 = vadd.f32 %v1297_v28, %v322_v27  ;;  %v339_v38 = vmax.f32 %v331_v32, 0.0  ;;  %v1708_v27 = vld [vmem:[#allocation11 + $0x100] sm:$0xff]  }
 0x1e0   :  { %v1483_v29 = vpop.f32.mrf.mxu1 }
 0x1e1   :  { %v334_v31 = vadd.f32 %v1483_v29, %v1297_v28  ;;  %v337_v36 = vmax.f32 %v323_v30, 0.0  ;;  %v940_v29 = vld [vmem:[#allocation8] sm:$0xf] }
 0x1e2   :  { %v325_v33 = vpop.f32.mrf.mxu1 }
 0x1e3   :  { %v326_v34 = vadd.f32 %v1297_v28, %v325_v33  ;;  %v340_v35 = vmax.f32 %v334_v31, 0.0  ;;  %v1709_v28 = vld [vmem:[#allocation11 + $0x140] sm:$0xff]  }
 0x1e5   :  { %v338_v37 = vmax.f32 %v326_v34, 0.0  ;;  %v342_v40 = vpack.c.bf16 %v340_v35, %v339_v38  ;;  %v982_v34 = vsel %vm980_vm2, %v940_v29, 0  ;;  %v2060_v35 = vld [vmem:[%s2104_s3] sm:$0xf]  ;;  %v1712_v38 = vld [vmem:[#allocation10 + $0x28] sm:$0xff]  }
 0x1e7   :  { %v341_v39 = vpack.c.bf16 %v338_v37, %v337_v36  ;;  %v1710_v36 = vld [vmem:[#allocation10 + $0x38] sm:$0xff]   ;;  %v1711_v37 = vld [vmem:[#allocation10 + $0x30] sm:$0xff]  }
 0x1e9   :  { %1500 = vmatprep.mubr.bf16.mxu0 %v341_v39  ;;  %v1713_v39 = vld [vmem:[#allocation10 + $0x20] sm:$0xff]  }
 0x1ea   :  { %1501 = vmatmul.mubr.bf16.vlgmr.msra.gmra.mxu0 %v342_v40  ;;  %v1714_v40 = vld [vmem:[#allocation10 + $0x18] sm:$0xff]  }
 0x1eb   :  { %1513 = vmatpush3.bf16.msra.mxu0 %v1678_v41  ;;  %1528 = vmatprep.mubr.msk.bf16.mxu0 %vm1907_vm1, %v1906_v42  ;;  %v1715_v41 = vld [vmem:[#allocation10 + $0x10] sm:$0xff]  }
 0x1ec   :  { %1514 = vmatprep.subr.bf16.mxu0 %v1906_v42 }
 0x1ef   :  { %1515 = vmatpush3.bf16.msra.mxu0 %v1680_v43  ;;  %v1716_v43 = vld [vmem:[#allocation10 + $0x8] sm:$0xff]  }
 0x1f0   :  { %1516 = vmatprep.subr.bf16.mxu0 %v1906_v42 }
 0x1f3   :  { %1517 = vmatpush3.bf16.msra.mxu0 %v1682_v44  ;;  %v1717_v44 = vld [vmem:[#allocation10] sm:$0xff]  }
 0x1f4   :  { %1518 = vmatprep.subr.bf16.mxu0 %v1906_v42 }
 0x1f7   :  { %1519 = vmatpush3.bf16.msra.mxu0 %v1684_v45  ;;  %v1718_v45 = vld [vmem:[#allocation11 + $0x78] sm:$0xff]  }
 0x1f8   :  { %1520 = vmatprep.subr.bf16.mxu0 %v1906_v42 }
 0x1fb   :  { %1521 = vmatpush3.bf16.msra.mxu0 %v1686_v56 }
 0x1fc   :  { %1522 = vmatprep.subr.bf16.mxu0 %v1906_v42 }
 0x1ff   :  { %1523 = vmatpush3.bf16.msra.mxu0 %v1688_v58 }
 0x200   :  { %1524 = vmatprep.subr.bf16.mxu0 %v1906_v42 }
 0x203   :  { %1525 = vmatpush3.bf16.msra.mxu0 %v1690_v60 }
 0x204   :  { %1526 = vmatprep.subr.bf16.mxu0 %v1906_v42 }
 0x207   :  { %1527 = vmatpush3.bf16.msra.mxu0 %v1692_v62 }
 0x208   :  { %1552 = vmatprep.subr.bf16.mxu0 %v1906_v42 }
 0x2aa   :  { %v1502_v46 = vpop.f32.mrf.mxu0 }
 0x2ac   :  { %v425_v47 = vpop.f32.mrf.mxu0 }
 0x2ae   :  { %v1503_v48 = vpop.f32.mrf.mxu0 }
 0x2af   :  { %v441_v49 = vpack.c.bf16 %v1503_v48, %v1502_v46  ;;  %v1719_v46 = vld [vmem:[#allocation11 + $0x70] sm:$0xff]   ;;  %v1721_v48 = vld [vmem:[#allocation11 + $0x60] sm:$0xff]  }
 0x2b0   :  { %v428_v50 = vpop.f32.mrf.mxu0 }
 0x2b1   :  { %v440_v51 = vpack.c.bf16 %v428_v50, %v425_v47  ;;  %1504 = vmatprep.subr.bf16.mxu1 %v441_v49  ;;  %v1720_v47 = vld [vmem:[#allocation11 + $0x68] sm:$0xff]   ;;  %v1723_v50 = vld [vmem:[#allocation11 + $0x50] sm:$0xff]  }
 0x2b2   :  { %1505 = vmatpush3.bf16.msra.mxu1 %v441_v49  ;;  %v1722_v49 = vld [vmem:[#allocation11 + $0x58] sm:$0xff]  }
 0x2b3   :  { %1506 = vmatprep.subr.bf16.mxu1 %v440_v51 }
 0x2b6   :  { %1507 = vmatpush3.bf16.msra.mxu1 %v440_v51 }
 0x2b7   :  { %1532 = vmatprep.subr.bf16.mxu1 %v1906_v42 }
 0x2b9   :  { %1509 = vmatmul.mubr.msk.bf16.vlgmr.msra.gmra.mxu1 %vm178_vm0, %v1996_v5 }
 0x2ba   :  { %1533 = vmatpush3.bf16.msra.mxu1 %v1679_v52  ;;  %1548 = vmatprep.mubr.msk.bf16.mxu1 %vm1907_vm1, %v1906_v42 }
 0x2bb   :  { %1534 = vmatprep.subr.bf16.mxu1 %v1906_v42 }
 0x2be   :  { %1535 = vmatpush3.bf16.msra.mxu1 %v1681_v53 }
 0x2bf   :  { %1536 = vmatprep.subr.bf16.mxu1 %v1906_v42 }
 0x2c2   :  { %1537 = vmatpush3.bf16.msra.mxu1 %v1683_v54 }
 0x2c3   :  { %1538 = vmatprep.subr.bf16.mxu1 %v1906_v42 }
 0x2c6   :  { %1539 = vmatpush3.bf16.msra.mxu1 %v1685_v55 }
 0x2c7   :  { %1540 = vmatprep.subr.bf16.mxu1 %v1906_v42 }
 0x2ca   :  { %1541 = vmatpush3.bf16.msra.mxu1 %v1687_v57 }
 0x2cb   :  { %1542 = vmatprep.subr.bf16.mxu1 %v1906_v42 }
 0x2ce   :  { %1543 = vmatpush3.bf16.msra.mxu1 %v1689_v59  ;;  %v1325_v59 = vld [vmem:[%s2108_s7 + $0x4] ss:$0 sm:$0xff] }
 0x2cf   :  { %1544 = vmatprep.subr.bf16.mxu1 %v1906_v42 }
 0x2d2   :  { %1545 = vmatpush3.bf16.msra.mxu1 %v1691_v61 }
 0x2d3   :  { %1546 = vmatprep.subr.bf16.mxu1 %v1906_v42 }
 0x2d6   :  { %1547 = vmatpush3.bf16.msra.mxu1 %v1693_v63 }
 0x2d7   :  { %1572 = vmatprep.subr.bf16.mxu1 %v1906_v42 }
 0x379   :  { %v1510_v1 = vpop.f32.mrf.mxu1 }
 0x37a   :  { %v489_v2 = vadd.f32 %v1510_v1, %v1314_v0 }
 0x37b   :  { %v480_v3 = vpop.f32.mrf.mxu1 }
 0x37c   :  { %497 = vst [vmem:[#allocation14 + $0x10] sm:$0xff] %v489_v2  ;;  %v481_v4 = vadd.f32 %v1314_v0, %v480_v3 }
 0x37d   :  { %v1511_v5 = vpop.f32.mrf.mxu1 }
 0x37e   :  { %495 = vst [vmem:[#allocation14] sm:$0xff] %v481_v4  ;;  %v492_v6 = vadd.f32 %v1511_v5, %v1314_v0 }
 0x37f   :  { %v483_v7 = vpop.f32.mrf.mxu1 }
 0x380   :  { %498 = vst [vmem:[#allocation14 + $0x18] sm:$0xff] %v492_v6  ;;  %v484_v8 = vadd.f32 %v1314_v0, %v483_v7 }
 0x382   :  { %496 = vst [vmem:[#allocation14 + $0x8] sm:$0xff] %v484_v8 }
 0x389   :  { %v500_v10 = vld [vmem:[#allocation14] ss:$4 sm:$0xff]  ;;  %v613_v11 = vld [vmem:[#allocation14 + $0x1] ss:$4 sm:$0xff]  ;;  %v722_v30 = vld [vmem:[#allocation14 + $0x2] ss:$4 sm:$0xff] }
 0x38a   :  { %v501_v13 = vpack.c.bf16 %v500_v10, %v500_v10  ;;  %v614_v14 = vpack.c.bf16 %v613_v11, %v613_v11  ;;  %v831_v31 = vld [vmem:[#allocation14 + $0x3] ss:$4 sm:$0xff]  ;;  %v723_v32 = vpack.c.bf16 %v722_v30, %v722_v30 }
 0x38b   :  { %v832_v33 = vpack.c.bf16 %v831_v31, %v831_v31 }
 0x38c   :  { %1529 = vmatmul.mubr.bf16.vlgmr.msra.gmra.mxu0 %v501_v13  ;;  %1549 = vmatmul.mubr.bf16.vlgmr.msra.gmra.mxu1 %v614_v14  ;;  %v1724_v13 = vld [vmem:[#allocation11 + $0x48] sm:$0xff]   ;;  %v1725_v14 = vld [vmem:[#allocation11 + $0x40] sm:$0xff]  }
 0x38d   :  { %1553 = vmatpush3.bf16.msra.mxu0 %v1694_v9  ;;  %1573 = vmatpush3.bf16.msra.mxu1 %v1695_v12 }
 0x38e   :  { %1554 = vmatprep.subr.bf16.mxu0 %v1906_v42  ;;  %1574 = vmatprep.subr.bf16.mxu1 %v1906_v42 }
 0x38f   :  { %1568 = vmatprep.mubr.msk.bf16.mxu0 %vm1907_vm1, %v1906_v42  ;;  %1588 = vmatprep.mubr.msk.bf16.mxu1 %vm1907_vm1, %v1906_v42 }
 0x391   :  { %1555 = vmatpush3.bf16.msra.mxu0 %v1696_v15  ;;  %1575 = vmatpush3.bf16.msra.mxu1 %v1697_v16  ;;  %v1351_v15 = vld [vmem:[%s2108_s7 + $0x2] ss:$0 sm:$0xff] }
 0x392   :  { %1556 = vmatprep.subr.bf16.mxu0 %v1906_v42  ;;  %1576 = vmatprep.subr.bf16.mxu1 %v1906_v42 }
 0x395   :  { %1557 = vmatpush3.bf16.msra.mxu0 %v1698_v17  ;;  %1577 = vmatpush3.bf16.msra.mxu1 %v1699_v18 }
 0x396   :  { %1558 = vmatprep.subr.bf16.mxu0 %v1906_v42  ;;  %1578 = vmatprep.subr.bf16.mxu1 %v1906_v42 }
 0x399   :  { %1559 = vmatpush3.bf16.msra.mxu0 %v1700_v19  ;;  %1579 = vmatpush3.bf16.msra.mxu1 %v1701_v20 }
 0x39a   :  { %1560 = vmatprep.subr.bf16.mxu0 %v1906_v42  ;;  %1580 = vmatprep.subr.bf16.mxu1 %v1906_v42 }
 0x39d   :  { %1561 = vmatpush3.bf16.msra.mxu0 %v1702_v21  ;;  %1581 = vmatpush3.bf16.msra.mxu1 %v1703_v22 }
 0x39e   :  { %1562 = vmatprep.subr.bf16.mxu0 %v1906_v42  ;;  %1582 = vmatprep.subr.bf16.mxu1 %v1906_v42 }
 0x3a1   :  { %1563 = vmatpush3.bf16.msra.mxu0 %v1704_v23  ;;  %1583 = vmatpush3.bf16.msra.mxu1 %v1705_v24 }
 0x3a2   :  { %1564 = vmatprep.subr.bf16.mxu0 %v1906_v42  ;;  %1584 = vmatprep.subr.bf16.mxu1 %v1906_v42 }
 0x3a5   :  { %1565 = vmatpush3.bf16.msra.mxu0 %v1706_v25  ;;  %1585 = vmatpush3.bf16.msra.mxu1 %v1707_v26 }
 0x3a6   :  { %1566 = vmatprep.subr.bf16.mxu0 %v1906_v42  ;;  %1586 = vmatprep.subr.bf16.mxu1 %v1906_v42 }
 0x3a9   :  { %1567 = vmatpush3.bf16.msra.mxu0 %v1708_v27  ;;  %1587 = vmatpush3.bf16.msra.mxu1 %v1709_v28 }
 0x3aa   :  { %1592 = vmatprep.subr.bf16.mxu0 %v1906_v42  ;;  %1598 = vmatprep.subr.bf16.mxu1 %v1906_v42 }
 0x3ac   :  { %1569 = vmatmul.mubr.bf16.vlgmr.msra.gmra.mxu0 %v723_v32  ;;  %1589 = vmatmul.mubr.bf16.vlgmr.msra.gmra.mxu1 %v832_v33 }
 0x3ad   :  { %1593 = vmatpush3.bf16.msra.mxu0 %v982_v34  ;;  %1594 = vmatprep.mubr.msk.bf16.mxu0 %vm1907_vm1, %v1906_v42 }
 0x3ae   :  { %1614 = vmatprep.mubr.msk.bf16.mxu1 %vm1907_vm1, %v1906_v42  ;;  %1618 = vmatprep.subr.bf16.mxu0 %v1906_v42 }
 0x3af   :  { %1599 = vmatpush3.bf16.msra.mxu1 %v1710_v36 }
 0x3b0   :  { %1600 = vmatprep.subr.bf16.mxu1 %v1906_v42 }
 0x3b3   :  { %1601 = vmatpush3.bf16.msra.mxu1 %v1711_v37 }
 0x3b4   :  { %1595 = vmatmul.mubr.msk.bf16.vlgmr.msra.gmra.mxu0 %vm976_vm3, %v2060_v35  ;;  %1602 = vmatprep.subr.bf16.mxu1 %v1906_v42 }
 0x3b5   :  { %1634 = vmatprep.mubr.msk.bf16.mxu0 %vm1907_vm1, %v1906_v42  ;;  %1619 = vmatpush3.bf16.msra.mxu0 %v1718_v45 }
 0x3b6   :  { %1620 = vmatprep.subr.bf16.mxu0 %v1906_v42 }
 0x3b7   :  { %1603 = vmatpush3.bf16.msra.mxu1 %v1712_v38 }
 0x3b8   :  { %1604 = vmatprep.subr.bf16.mxu1 %v1906_v42 }
 0x3b9   :  { %1621 = vmatpush3.bf16.msra.mxu0 %v1719_v46 }
 0x3ba   :  { %1622 = vmatprep.subr.bf16.mxu0 %v1906_v42 }
 0x3bb   :  { %1605 = vmatpush3.bf16.msra.mxu1 %v1713_v39 }
 0x3bc   :  { %1606 = vmatprep.subr.bf16.mxu1 %v1906_v42 }
 0x3bd   :  { %1623 = vmatpush3.bf16.msra.mxu0 %v1720_v47 }
 0x3be   :  { %1624 = vmatprep.subr.bf16.mxu0 %v1906_v42 }
 0x3bf   :  { %1607 = vmatpush3.bf16.msra.mxu1 %v1714_v40 }
 0x3c0   :  { %1608 = vmatprep.subr.bf16.mxu1 %v1906_v42 }
 0x3c1   :  { %1625 = vmatpush3.bf16.msra.mxu0 %v1721_v48 }
 0x3c2   :  { %1626 = vmatprep.subr.bf16.mxu0 %v1906_v42 }
 0x3c3   :  { %1609 = vmatpush3.bf16.msra.mxu1 %v1715_v41 }
 0x3c4   :  { %1610 = vmatprep.subr.bf16.mxu1 %v1906_v42 }
 0x3c5   :  { %1627 = vmatpush3.bf16.msra.mxu0 %v1722_v49 }
 0x3c6   :  { %1628 = vmatprep.subr.bf16.mxu0 %v1906_v42 }
 0x3c7   :  { %1611 = vmatpush3.bf16.msra.mxu1 %v1716_v43 }
 0x3c8   :  { %1612 = vmatprep.subr.bf16.mxu1 %v1906_v42 }
 0x3c9   :  { %1629 = vmatpush3.bf16.msra.mxu0 %v1723_v50 }
 0x3ca   :  { %1630 = vmatprep.subr.bf16.mxu0 %v1906_v42 }
 0x3cb   :  { %1613 = vmatpush3.bf16.msra.mxu1 %v1717_v44 }
 0x3cc   :  { %1638 = vmatprep.subr.bf16.mxu1 %v1906_v42 }
 0x3cd   :  { %1631 = vmatpush3.bf16.msra.mxu0 %v1724_v13 }
 0x3ce   :  { %1632 = vmatprep.subr.bf16.mxu0 %v1906_v42 }
 0x3d1   :  { %1633 = vmatpush3.bf16.msra.mxu0 %v1725_v14 }
 0x44c   :  { %v601_v51 = vpop.f32.mrf.mxu0  ;;  %v714_v52 = vpop.f32.mrf.mxu1 }
 0x44d   :  { %v611_v60 = vadd.f32 %v1325_v59, %v601_v51 }
 0x44e   :  { %v1530_v53 = vpop.f32.mrf.mxu0  ;;  %v1550_v54 = vpop.f32.mrf.mxu1 }
 0x44f   :  { %v720_v61 = vadd.f32 %v714_v52, %v611_v60 }
 0x450   :  { %v604_v55 = vpop.f32.mrf.mxu0  ;;  %v717_v56 = vpop.f32.mrf.mxu1 }
 0x452   :  { %v1531_v57 = vpop.f32.mrf.mxu0  ;;  %v1551_v58 = vpop.f32.mrf.mxu1 }
 0x46c   :  { %v823_v62 = vpop.f32.mrf.mxu0  ;;  %v932_v63 = vpop.f32.mrf.mxu1 }
 0x46d   :  { %v829_v0 = vadd.f32 %v823_v62, %v720_v61 }
 0x46e   :  { %v1570_v1 = vpop.f32.mrf.mxu0  ;;  %v1590_v2 = vpop.f32.mrf.mxu1 }
 0x46f   :  { %v938_v3 = vadd.f32 %v932_v63, %v829_v0 }
 0x470   :  { %v826_v4 = vpop.f32.mrf.mxu0  ;;  %v935_v5 = vpop.f32.mrf.mxu1 }
 0x471   :  { %1256 = vst [vmem:[#allocation13 + $0x8] sm:$0xff] %v938_v3 }
 0x472   :  { %v1571_v6 = vpop.f32.mrf.mxu0  ;;  %v1591_v7 = vpop.f32.mrf.mxu1 }
 0x474   :  { %v1018_v8 = vpop.f32.mrf.mxu0 }
 0x475   :  { %v1024_v9 = vpack.c.bf16 %v1018_v8, %v1018_v8 }
 0x476   :  { %v1596_v10 = vpop.f32.mrf.mxu0 }
 0x477   :  { %1615 = vmatmul.mubr.bf16.vlgmr.msra.gmra.mxu1 %v1024_v9 }
 0x478   :  { %v1021_v11 = vpop.f32.mrf.mxu0  ;;  %1640 = vmatprep.mubr.msk.bf16.mxu1 %vm1907_vm1, %v1906_v42 }
 0x47a   :  { %v1597_v12 = vpop.f32.mrf.mxu0 }
 0x537   :  { %v1111_v16 = vpop.f32.mrf.mxu1 }
 0x538   :  { %v1112_v17 = vadd.f32 %v1351_v15, %v1111_v16 }
 0x539   :  { %v1616_v18 = vpop.f32.mrf.mxu1 }
 0x53a   :  { %v1117_v19 = vmax.f32 %v1112_v17, 0.0 }
 0x53b   :  { %v1114_v20 = vpop.f32.mrf.mxu1 }
 0x53c   :  { %v1118_v21 = vpack.c.bf16 %v1117_v19, %v1117_v19 }
 0x53d   :  { %v1617_v22 = vpop.f32.mrf.mxu1 }
 0x53e   :  { %1635 = vmatmul.mubr.bf16.vlgmr.msra.gmra.mxu0 %v1118_v21 }
 0x5fe   :  { %v1201_v23 = vpop.f32.mrf.mxu0 }
 0x5ff   :  { %v1207_v24 = vpack.c.bf16 %v1201_v23, %v1201_v23 }
 0x600   :  { %v1636_v25 = vpop.f32.mrf.mxu0 }
 0x601   :  { %v1213_v26 = vsel %vm980_vm2, %v1207_v24, 0 }
 0x602   :  { %v1204_v42 = vpop.f32.mrf.mxu0  ;;  %1639 = vmatpush3.bf16.msra.mxu1 %v1213_v26 }
 0x604   :  { %v1637_v27 = vpop.f32.mrf.mxu0 }
 0x605   :  { %1641 = vmatmul.mubr.msk.bf16.vlgmr.msra.gmra.mxu1 %vm976_vm3, %v2060_v35 }
 0x606   :  { %1857 = shalt.err (!%p1854_p6)
}
 0x607   :  { %s1909_s1 = smov 128   ;;  %s1910_s26 = smov 8   ;;  %v1368_v28 = vld [vmem:[%s2108_s7 + $0x3] ss:$0 sm:$0xff] }
 0x608   :  { %1278 = dma.vmem_to_hbm [thread:$0]  %s1273_s24, 512, %s2110_s9, [#allocation15], %s1909_s1, %s1909_s1, %s1910_s26  }
 0x609   :  { %s1911_s30 = smov [#allocation13]  }
 0x60a   :  { %s1263_s10 = sshll.u32 %s1911_s30, 4  ;;  %s1264_s10 = int_to_ptr.vmem [resolvable:$true] %s1263_s10 }
 0x60b   :  { %s1866_s11 = scalar_lea.vmem %s1264_s10, 256  ;;  %p1871_p8 = scmp.lt.s32.totalorder %s1264_s10, %s1264_s10 }
 0x60c   :  { %p1867_p7 = scmp.ne.s32.totalorder %s1264_s10, %s1866_s11  ;;  %p1872_p9 = scmp.lt.s32.totalorder %s1866_s11, %s1866_s11 }
 0x60e   :  { %p1873_p10 = por %p1872_p9, %p1871_p8 }
 0x610   :  { %p1874_p11 = pnand %p1873_p10, %p1867_p7 }
 0x6c5   :  { %v1249_v29 = vpop.f32.mrf.mxu1 }
 0x6c6   :  { %v1250_v30 = vadd.f32 %v1368_v28, %v1249_v29 }
 0x6c7   :  { %v1642_v31 = vpop.f32.mrf.mxu1 }
 0x6c8   :  { %1255 = vst [vmem:[#allocation13] sm:$0xff] %v1250_v30 }
 0x6c9   :  { %v1252_v32 = vpop.f32.mrf.mxu1 }
 0x6ca   :  { %1877 = shalt.err (!%p1874_p11)
}
 0x6cb   :  { %1266 = dma.vmem_to_hbm [thread:$0]  %s1264_s10, 256, %s2109_s8, [#allocation4]   ;;  %v1643_v33 = vpop.f32.mrf.mxu1 }
 0x6cc   :  { %1894 = dma.done.wait [#allocation4], 256  }
 0x6cd   :  { %1895 = vsyncadd [#allocation4], 4294967040 }
 0x6ce   :  { %1896 = dma.done.wait [#allocation15], 512  }
 0x6cf   :  { %1897 = vsyncadd [#allocation15], 4294966784 }
 0x6d0   :  { %1285 = vsyncpa [#allocation3], 1 }
 0x6d1   :  { %1286 = vsyncpa [#allocation6], 1 }
 0x6d2   :  { %1287 = vsyncpa [#allocation9], 1 }
 0x6d3   :  { %1288 = vsyncpa [#allocation12], 1 }
 0x6d4   :  { %1289 = vsyncpa [#allocation4], 1 }
 0x6d5   :  { %1290 = vsyncpa [#allocation15], 1 }

</bundles_post_ra>
